<compile_context>
chip_gen: v5e
topology: v5e:2x2
jax: 0.10.0
libtpu: 0.0.40
codegen_flags: <defaults>
</compile_context>

<pallas_src>
import functools

import jax
import jax.numpy as jnp
from jax.experimental import pallas as pl
from jax.experimental.pallas import tpu as pltpu


# --------------------------------------------------------------------------
# Pallas kernel: fused Blinn-Phong shading for a tile of TM*128 points.
# --------------------------------------------------------------------------
def _blinn_phong_kernel(params_ref, data_ref, out_ref):
    # params_ref : SMEM f32[12]  = [view(3), light_pos(3), light_col(3), ambient(3)]
    # data_ref   : VMEM f32[10, TM, 128] = [pos(3), nrm(3), mat(3), shininess(1)]
    # out_ref    : VMEM f32[3,  TM, 128]
    eps2 = jnp.float32(1e-24)  # (1e-12)^2 -> matches F.normalize eps on the norm

    px, py, pz = data_ref[0], data_ref[1], data_ref[2]
    nx, ny, nz = data_ref[3], data_ref[4], data_ref[5]
    mx, my, mz = data_ref[6], data_ref[7], data_ref[8]
    sh = data_ref[9]

    vx, vy, vz = params_ref[0], params_ref[1], params_ref[2]
    lx, ly, lz = params_ref[3], params_ref[4], params_ref[5]
    lcr, lcg, lcb = params_ref[6], params_ref[7], params_ref[8]
    ar, ag, ab = params_ref[9], params_ref[10], params_ref[11]

    def inv_norm(x, y, z):
        # rsqrt of (clamped) squared norm: 1 EUP op + VPU muls, no divides.
        return jax.lax.rsqrt(jnp.maximum(x * x + y * y + z * z, eps2))

    # normalize(normals)
    inn = inv_norm(nx, ny, nz)
    nx, ny, nz = nx * inn, ny * inn, nz * inn

    # normalize(light_position - positions)
    ldx, ldy, ldz = lx - px, ly - py, lz - pz
    ild = inv_norm(ldx, ldy, ldz)
    ldx, ldy, ldz = ldx * ild, ldy * ild, ldz * ild

    # normalize(viewPos - positions)
    vdx, vdy, vdz = vx - px, vy - py, vz - pz
    ivd = inv_norm(vdx, vdy, vdz)
    vdx, vdy, vdz = vdx * ivd, vdy * ivd, vdz * ivd

    # normalize(light_dir + view_dir)
    hx, hy, hz = ldx + vdx, ldy + vdy, ldz + vdz
    ih = inv_norm(hx, hy, hz)
    hx, hy, hz = hx * ih, hy * ih, hz * ih

    diffuse = jnp.maximum(nx * ldx + ny * ldy + nz * ldz, jnp.float32(0.0))
    spec_base = jnp.maximum(nx * hx + ny * hy + nz * hz, jnp.float32(1e-6))
    # pow(spec_base, clamp_min(shininess, 0)) as exp(log): exactly 2 EUP ops.
    spec = jnp.exp(jnp.maximum(sh, jnp.float32(0.0)) * jnp.log(spec_base))

    out_ref[0] = lcr * (mx * diffuse + spec) + ar
    out_ref[1] = lcg * (my * diffuse + spec) + ag
    out_ref[2] = lcb * (mz * diffuse + spec) + ab


# --------------------------------------------------------------------------
# Wrapper: pack inputs channel-major/planar, precompute param scalars, call.
# --------------------------------------------------------------------------
@functools.partial(jax.jit, static_argnames=("tile_points",))
def blinn_phong_forward(view_pos, positions, normals, material_colors,
                        shininess, light_position, light_color,
                        ambient_color, ambient_intensity, *,
                        tile_points=8192):
    assert tile_points % 128 == 0
    f32 = jnp.float32
    n_pts = positions.shape[0]

    # Tile size: big by default, shrunk to the (128-rounded) problem size so
    # tiny inputs don't get padded to a full 8K tile.
    n_pad128 = pl.cdiv(n_pts, 128) * 128
    tile_n = min(tile_points, n_pad128)
    n_pad = pl.cdiv(n_pad128, tile_n) * tile_n
    tm = tile_n // 128
    n_rows = n_pad // 128
    grid = (n_pad // tile_n,)

    # --- single fused layout pass: [N,10] -> [10, n_pad] -> (10, n_pad/128, 128)
    packed = jnp.concatenate(
        [jnp.asarray(positions, f32).reshape(n_pts, 3),
         jnp.asarray(normals, f32).reshape(n_pts, 3),
         jnp.asarray(material_colors, f32).reshape(n_pts, 3),
         jnp.asarray(shininess, f32).reshape(n_pts, 1)], axis=1)       # (N, 10)
    packed = jnp.pad(packed.T, ((0, 0), (0, n_pad - n_pts)))           # (10, n_pad)
    packed = packed.reshape(10, n_rows, 128)                           # planar

    # --- small params precomputed once (sigmoid already in [0,1]; clip is a no-op
    #     in exact arithmetic, kept for parity with the torch code).
    lc = jnp.clip(jax.nn.sigmoid(jnp.asarray(light_color, f32).reshape(3)),
                  0.0, 1.0)
    amb = (jax.nn.sigmoid(jnp.asarray(ambient_color, f32).reshape(3))
           * jnp.asarray(ambient_intensity, f32).reshape(()))
    params = jnp.concatenate(
        [jnp.asarray(view_pos, f32).reshape(3),
         jnp.asarray(light_position, f32).reshape(3),
         lc, amb]).astype(f32)                                          # (12,)

    out_planar = pl.pallas_call(
        _blinn_phong_kernel,
        out_shape=jax.ShapeDtypeStruct((3, n_rows, 128), f32),
        grid_spec=pltpu.PrefetchScalarGridSpec(
            num_scalar_prefetch=0,
            grid=grid,
            in_specs=[
                pl.BlockSpec(memory_space=pltpu.MemorySpace.SMEM),      # params
                pl.BlockSpec((10, tm, 128), lambda i: (0, i, 0)),       # packed
            ],
            out_specs=pl.BlockSpec((3, tm, 128), lambda i: (0, i, 0)),
        ),
        compiler_params=pltpu.CompilerParams(
            dimension_semantics=("parallel",)),
    )(params, packed)

    # Back to the module's [N, 3] convention (one output copy).
    return out_planar.reshape(3, n_pad)[:, :n_pts].T


# --------------------------------------------------------------------------
# Pure-JAX reference (mirrors the PyTorch blinn_phong_shader).
# --------------------------------------------------------------------------
def blinn_phong_ref(view_pos, positions, normals, light_position, light_color,
                    material_color, shininess, ambient_color,
                    ambient_intensity):
    def normalize(v):
        nrm = jnp.linalg.norm(v, axis=1, keepdims=True)
        return v / jnp.maximum(nrm, 1e-12)

    normals = normalize(normals)
    light_dir = normalize(light_position - positions)
    view_dir = normalize(view_pos - positions)
    halfway = normalize(light_dir + view_dir)
    diffuse = jnp.maximum(jnp.sum(normals * light_dir, axis=1), 0.0)[:, None]
    diffuse = jnp.tile(diffuse, (1, 3))
    spec_base = jnp.maximum(jnp.sum(normals * halfway, axis=1), 1e-6)[:, None]
    spec = jnp.power(spec_base, jnp.maximum(shininess, 0.0))
    spec = jnp.tile(spec, (1, 3))
    lc = jnp.clip(jax.nn.sigmoid(light_color), 0.0, 1.0)
    amb = jax.nn.sigmoid(ambient_color) * ambient_intensity
    return lc[None, :] * (material_color * diffuse + spec) + amb[None, :]


if __name__ == "__main__":
    key = jax.random.PRNGKey(0)
    ks = jax.random.split(key, 9)

    def make_case(n_pts):
        view_pos = jax.random.normal(ks[0], (3,), jnp.float32) * 2.0
        positions = jax.random.normal(ks[1], (n_pts, 3), jnp.float32)
        normals = jax.random.normal(ks[2], (n_pts, 3), jnp.float32)
        material_colors = jax.random.uniform(ks[3], (n_pts, 3), jnp.float32)
        shininess = jax.random.uniform(ks[4], (n_pts, 1), jnp.float32,
                                       minval=-1.0, maxval=32.0)
        light_position = jax.random.normal(ks[5], (3,), jnp.float32) * 3.0
        light_color = jax.random.normal(ks[6], (3,), jnp.float32)
        ambient_color = jax.random.normal(ks[7], (3,), jnp.float32)
        ambient_intensity = jax.random.uniform(ks[8], (1,), jnp.float32)
        return (view_pos, positions, normals, material_colors, shininess,
                light_position, light_color, ambient_color, ambient_intensity)

    # Case 1: small N, not a multiple of 128 (single grid step).
    args = make_case(200)
    out = jax.block_until_ready(blinn_phong_forward(*args))
    ref = blinn_phong_ref(args[0], args[1], args[2], args[5], args[6],
                          args[3], args[4], args[7], args[8])
    assert out.shape == (200, 3) and out.dtype == jnp.float32
    assert jnp.allclose(out, ref, atol=1e-5, rtol=1e-5), (
        f"max err {jnp.max(jnp.abs(out - ref))}")

    # Case 2: multi-step grid (exercises the tiled/parallel pipeline).
    args = make_case(777)
    out = jax.block_until_ready(
        blinn_phong_forward(*args, tile_points=256))
    ref = blinn_phong_ref(args[0], args[1], args[2], args[5], args[6],
                          args[3], args[4], args[7], args[8])
    assert out.shape == (777, 3) and out.dtype == jnp.float32
    assert jnp.allclose(out, ref, atol=1e-5, rtol=1e-5), (
        f"max err {jnp.max(jnp.abs(out - ref))}")

    print("KERNEL_OK")
</pallas_src>

<mosaic_0001>
module attributes {stable_mosaic.version = 11 : i64} {
  func.func @_blinn_phong_kernel(%arg0: i32, %arg1: memref<12xf32, #tpu.memory_space<smem>>, %arg2: memref<10x2x128xf32, #tpu.memory_space<vmem>>, %arg3: memref<3x2x128xf32, #tpu.memory_space<vmem>>) attributes {dimension_semantics = [#tpu.dimension_semantics<parallel>], iteration_bounds = array<i64: 1>, scalar_prefetch = 0 : i64, scratch_operands = 0 : i64, tpu.core_type = #tpu.core_type<tc>, window_params = [{transform_indices = @transform_0, window_bounds = array<i64: 12>}, {transform_indices = @transform_1, window_bounds = array<i64: 10, 2, 128>}, {transform_indices = @transform_2, window_bounds = array<i64: 3, 2, 128>}]} {
    %c0 = arith.constant 0 : index
    %c0_0 = arith.constant 0 : index
    %c0_1 = arith.constant 0 : index
    %0 = vector.load %arg2[%c0, %c0_0, %c0_1] : memref<10x2x128xf32, #tpu.memory_space<vmem>>, vector<1x2x128xf32>
    %1 = vector.shape_cast %0 : vector<1x2x128xf32> to vector<2x128xf32>
    %c1 = arith.constant 1 : index
    %c0_2 = arith.constant 0 : index
    %c0_3 = arith.constant 0 : index
    %2 = vector.load %arg2[%c1, %c0_2, %c0_3] : memref<10x2x128xf32, #tpu.memory_space<vmem>>, vector<1x2x128xf32>
    %3 = vector.shape_cast %2 : vector<1x2x128xf32> to vector<2x128xf32>
    %c2 = arith.constant 2 : index
    %c0_4 = arith.constant 0 : index
    %c0_5 = arith.constant 0 : index
    %4 = vector.load %arg2[%c2, %c0_4, %c0_5] : memref<10x2x128xf32, #tpu.memory_space<vmem>>, vector<1x2x128xf32>
    %5 = vector.shape_cast %4 : vector<1x2x128xf32> to vector<2x128xf32>
    %c3 = arith.constant 3 : index
    %c0_6 = arith.constant 0 : index
    %c0_7 = arith.constant 0 : index
    %6 = vector.load %arg2[%c3, %c0_6, %c0_7] : memref<10x2x128xf32, #tpu.memory_space<vmem>>, vector<1x2x128xf32>
    %7 = vector.shape_cast %6 : vector<1x2x128xf32> to vector<2x128xf32>
    %c4 = arith.constant 4 : index
    %c0_8 = arith.constant 0 : index
    %c0_9 = arith.constant 0 : index
    %8 = vector.load %arg2[%c4, %c0_8, %c0_9] : memref<10x2x128xf32, #tpu.memory_space<vmem>>, vector<1x2x128xf32>
    %9 = vector.shape_cast %8 : vector<1x2x128xf32> to vector<2x128xf32>
    %c5 = arith.constant 5 : index
    %c0_10 = arith.constant 0 : index
    %c0_11 = arith.constant 0 : index
    %10 = vector.load %arg2[%c5, %c0_10, %c0_11] : memref<10x2x128xf32, #tpu.memory_space<vmem>>, vector<1x2x128xf32>
    %11 = vector.shape_cast %10 : vector<1x2x128xf32> to vector<2x128xf32>
    %c6 = arith.constant 6 : index
    %c0_12 = arith.constant 0 : index
    %c0_13 = arith.constant 0 : index
    %12 = vector.load %arg2[%c6, %c0_12, %c0_13] : memref<10x2x128xf32, #tpu.memory_space<vmem>>, vector<1x2x128xf32>
    %13 = vector.shape_cast %12 : vector<1x2x128xf32> to vector<2x128xf32>
    %c7 = arith.constant 7 : index
    %c0_14 = arith.constant 0 : index
    %c0_15 = arith.constant 0 : index
    %14 = vector.load %arg2[%c7, %c0_14, %c0_15] : memref<10x2x128xf32, #tpu.memory_space<vmem>>, vector<1x2x128xf32>
    %15 = vector.shape_cast %14 : vector<1x2x128xf32> to vector<2x128xf32>
    %c8 = arith.constant 8 : index
    %c0_16 = arith.constant 0 : index
    %c0_17 = arith.constant 0 : index
    %16 = vector.load %arg2[%c8, %c0_16, %c0_17] : memref<10x2x128xf32, #tpu.memory_space<vmem>>, vector<1x2x128xf32>
    %17 = vector.shape_cast %16 : vector<1x2x128xf32> to vector<2x128xf32>
    %c9 = arith.constant 9 : index
    %c0_18 = arith.constant 0 : index
    %c0_19 = arith.constant 0 : index
    %18 = vector.load %arg2[%c9, %c0_18, %c0_19] : memref<10x2x128xf32, #tpu.memory_space<vmem>>, vector<1x2x128xf32>
    %19 = vector.shape_cast %18 : vector<1x2x128xf32> to vector<2x128xf32>
    %c0_20 = arith.constant 0 : index
    %20 = memref.load %arg1[%c0_20] : memref<12xf32, #tpu.memory_space<smem>>
    %c1_21 = arith.constant 1 : index
    %21 = memref.load %arg1[%c1_21] : memref<12xf32, #tpu.memory_space<smem>>
    %c2_22 = arith.constant 2 : index
    %22 = memref.load %arg1[%c2_22] : memref<12xf32, #tpu.memory_space<smem>>
    %c3_23 = arith.constant 3 : index
    %23 = memref.load %arg1[%c3_23] : memref<12xf32, #tpu.memory_space<smem>>
    %c4_24 = arith.constant 4 : index
    %24 = memref.load %arg1[%c4_24] : memref<12xf32, #tpu.memory_space<smem>>
    %c5_25 = arith.constant 5 : index
    %25 = memref.load %arg1[%c5_25] : memref<12xf32, #tpu.memory_space<smem>>
    %c6_26 = arith.constant 6 : index
    %26 = memref.load %arg1[%c6_26] : memref<12xf32, #tpu.memory_space<smem>>
    %c7_27 = arith.constant 7 : index
    %27 = memref.load %arg1[%c7_27] : memref<12xf32, #tpu.memory_space<smem>>
    %c8_28 = arith.constant 8 : index
    %28 = memref.load %arg1[%c8_28] : memref<12xf32, #tpu.memory_space<smem>>
    %c9_29 = arith.constant 9 : index
    %29 = memref.load %arg1[%c9_29] : memref<12xf32, #tpu.memory_space<smem>>
    %c10 = arith.constant 10 : index
    %30 = memref.load %arg1[%c10] : memref<12xf32, #tpu.memory_space<smem>>
    %c11 = arith.constant 11 : index
    %31 = memref.load %arg1[%c11] : memref<12xf32, #tpu.memory_space<smem>>
    %32 = arith.mulf %7, %7 : vector<2x128xf32>
    %33 = arith.mulf %9, %9 : vector<2x128xf32>
    %34 = arith.addf %32, %33 : vector<2x128xf32>
    %35 = arith.mulf %11, %11 : vector<2x128xf32>
    %36 = arith.addf %34, %35 : vector<2x128xf32>
    %cst = arith.constant 1.000000e-24 : f32
    %37 = vector.broadcast %cst : f32 to vector<2x128xf32>
    %38 = arith.maximumf %36, %37 : vector<2x128xf32>
    %39 = math.rsqrt %38 : vector<2x128xf32>
    %40 = arith.mulf %7, %39 : vector<2x128xf32>
    %41 = arith.mulf %9, %39 : vector<2x128xf32>
    %42 = arith.mulf %11, %39 : vector<2x128xf32>
    %43 = vector.broadcast %23 : f32 to vector<2x128xf32>
    %44 = arith.subf %43, %1 : vector<2x128xf32>
    %45 = vector.broadcast %24 : f32 to vector<2x128xf32>
    %46 = arith.subf %45, %3 : vector<2x128xf32>
    %47 = vector.broadcast %25 : f32 to vector<2x128xf32>
    %48 = arith.subf %47, %5 : vector<2x128xf32>
    %49 = arith.mulf %44, %44 : vector<2x128xf32>
    %50 = arith.mulf %46, %46 : vector<2x128xf32>
    %51 = arith.addf %49, %50 : vector<2x128xf32>
    %52 = arith.mulf %48, %48 : vector<2x128xf32>
    %53 = arith.addf %51, %52 : vector<2x128xf32>
    %cst_30 = arith.constant 1.000000e-24 : f32
    %54 = vector.broadcast %cst_30 : f32 to vector<2x128xf32>
    %55 = arith.maximumf %53, %54 : vector<2x128xf32>
    %56 = math.rsqrt %55 : vector<2x128xf32>
    %57 = arith.mulf %44, %56 : vector<2x128xf32>
    %58 = arith.mulf %46, %56 : vector<2x128xf32>
    %59 = arith.mulf %48, %56 : vector<2x128xf32>
    %60 = vector.broadcast %20 : f32 to vector<2x128xf32>
    %61 = arith.subf %60, %1 : vector<2x128xf32>
    %62 = vector.broadcast %21 : f32 to vector<2x128xf32>
    %63 = arith.subf %62, %3 : vector<2x128xf32>
    %64 = vector.broadcast %22 : f32 to vector<2x128xf32>
    %65 = arith.subf %64, %5 : vector<2x128xf32>
    %66 = arith.mulf %61, %61 : vector<2x128xf32>
    %67 = arith.mulf %63, %63 : vector<2x128xf32>
    %68 = arith.addf %66, %67 : vector<2x128xf32>
    %69 = arith.mulf %65, %65 : vector<2x128xf32>
    %70 = arith.addf %68, %69 : vector<2x128xf32>
    %cst_31 = arith.constant 1.000000e-24 : f32
    %71 = vector.broadcast %cst_31 : f32 to vector<2x128xf32>
    %72 = arith.maximumf %70, %71 : vector<2x128xf32>
    %73 = math.rsqrt %72 : vector<2x128xf32>
    %74 = arith.mulf %61, %73 : vector<2x128xf32>
    %75 = arith.mulf %63, %73 : vector<2x128xf32>
    %76 = arith.mulf %65, %73 : vector<2x128xf32>
    %77 = arith.addf %57, %74 : vector<2x128xf32>
    %78 = arith.addf %58, %75 : vector<2x128xf32>
    %79 = arith.addf %59, %76 : vector<2x128xf32>
    %80 = arith.mulf %77, %77 : vector<2x128xf32>
    %81 = arith.mulf %78, %78 : vector<2x128xf32>
    %82 = arith.addf %80, %81 : vector<2x128xf32>
    %83 = arith.mulf %79, %79 : vector<2x128xf32>
    %84 = arith.addf %82, %83 : vector<2x128xf32>
    %cst_32 = arith.constant 1.000000e-24 : f32
    %85 = vector.broadcast %cst_32 : f32 to vector<2x128xf32>
    %86 = arith.maximumf %84, %85 : vector<2x128xf32>
    %87 = math.rsqrt %86 : vector<2x128xf32>
    %88 = arith.mulf %77, %87 : vector<2x128xf32>
    %89 = arith.mulf %78, %87 : vector<2x128xf32>
    %90 = arith.mulf %79, %87 : vector<2x128xf32>
    %91 = arith.mulf %40, %57 : vector<2x128xf32>
    %92 = arith.mulf %41, %58 : vector<2x128xf32>
    %93 = arith.addf %91, %92 : vector<2x128xf32>
    %94 = arith.mulf %42, %59 : vector<2x128xf32>
    %95 = arith.addf %93, %94 : vector<2x128xf32>
    %cst_33 = arith.constant 0.000000e+00 : f32
    %96 = vector.broadcast %cst_33 : f32 to vector<2x128xf32>
    %97 = arith.maximumf %95, %96 : vector<2x128xf32>
    %98 = arith.mulf %40, %88 : vector<2x128xf32>
    %99 = arith.mulf %41, %89 : vector<2x128xf32>
    %100 = arith.addf %98, %99 : vector<2x128xf32>
    %101 = arith.mulf %42, %90 : vector<2x128xf32>
    %102 = arith.addf %100, %101 : vector<2x128xf32>
    %cst_34 = arith.constant 9.99999997E-7 : f32
    %103 = vector.broadcast %cst_34 : f32 to vector<2x128xf32>
    %104 = arith.maximumf %102, %103 : vector<2x128xf32>
    %cst_35 = arith.constant 0.000000e+00 : f32
    %105 = vector.broadcast %cst_35 : f32 to vector<2x128xf32>
    %106 = arith.maximumf %19, %105 : vector<2x128xf32>
    %107 = math.log %104 : vector<2x128xf32>
    %108 = arith.mulf %106, %107 : vector<2x128xf32>
    %109 = math.exp %108 : vector<2x128xf32>
    %110 = arith.mulf %13, %97 : vector<2x128xf32>
    %111 = arith.addf %110, %109 : vector<2x128xf32>
    %112 = vector.broadcast %26 : f32 to vector<2x128xf32>
    %113 = arith.mulf %112, %111 : vector<2x128xf32>
    %114 = vector.broadcast %29 : f32 to vector<2x128xf32>
    %115 = arith.addf %113, %114 : vector<2x128xf32>
    %c0_36 = arith.constant 0 : index
    %c0_37 = arith.constant 0 : index
    %c0_38 = arith.constant 0 : index
    %116 = vector.load %arg3[%c0_36, %c0_37, %c0_38] : memref<3x2x128xf32, #tpu.memory_space<vmem>>, vector<1x2x128xf32>
    %117 = vector.shape_cast %116 : vector<1x2x128xf32> to vector<2x128xf32>
    %118 = vector.shape_cast %115 : vector<2x128xf32> to vector<1x2x128xf32>
    tpu.vector_store %arg3[%c0_36, %c0_37, %c0_38], %118 {strides = array<i32>} : memref<3x2x128xf32, #tpu.memory_space<vmem>>, vector<1x2x128xf32>,
    %119 = arith.mulf %15, %97 : vector<2x128xf32>
    %120 = arith.addf %119, %109 : vector<2x128xf32>
    %121 = vector.broadcast %27 : f32 to vector<2x128xf32>
    %122 = arith.mulf %121, %120 : vector<2x128xf32>
    %123 = vector.broadcast %30 : f32 to vector<2x128xf32>
    %124 = arith.addf %122, %123 : vector<2x128xf32>
    %c1_39 = arith.constant 1 : index
    %c0_40 = arith.constant 0 : index
    %c0_41 = arith.constant 0 : index
    %125 = vector.load %arg3[%c1_39, %c0_40, %c0_41] : memref<3x2x128xf32, #tpu.memory_space<vmem>>, vector<1x2x128xf32>
    %126 = vector.shape_cast %125 : vector<1x2x128xf32> to vector<2x128xf32>
    %127 = vector.shape_cast %124 : vector<2x128xf32> to vector<1x2x128xf32>
    tpu.vector_store %arg3[%c1_39, %c0_40, %c0_41], %127 {strides = array<i32>} : memref<3x2x128xf32, #tpu.memory_space<vmem>>, vector<1x2x128xf32>,
    %128 = arith.mulf %17, %97 : vector<2x128xf32>
    %129 = arith.addf %128, %109 : vector<2x128xf32>
    %130 = vector.broadcast %28 : f32 to vector<2x128xf32>
    %131 = arith.mulf %130, %129 : vector<2x128xf32>
    %132 = vector.broadcast %31 : f32 to vector<2x128xf32>
    %133 = arith.addf %131, %132 : vector<2x128xf32>
    %c2_42 = arith.constant 2 : index
    %c0_43 = arith.constant 0 : index
    %c0_44 = arith.constant 0 : index
    %134 = vector.load %arg3[%c2_42, %c0_43, %c0_44] : memref<3x2x128xf32, #tpu.memory_space<vmem>>, vector<1x2x128xf32>
    %135 = vector.shape_cast %134 : vector<1x2x128xf32> to vector<2x128xf32>
    %136 = vector.shape_cast %133 : vector<2x128xf32> to vector<1x2x128xf32>
    tpu.vector_store %arg3[%c2_42, %c0_43, %c0_44], %136 {strides = array<i32>} : memref<3x2x128xf32, #tpu.memory_space<vmem>>, vector<1x2x128xf32>,
    return
  }
  func.func @transform_0(%arg0: i32) -> i32 {
    %c0_i32 = arith.constant 0 : i32
    %c0_i32_0 = arith.constant 0 : i32
    return %c0_i32 : i32
  }
  func.func @transform_1(%arg0: i32) -> (i32, i32, i32) {
    %c0_i32 = arith.constant 0 : i32
    %c0_i32_0 = arith.constant 0 : i32
    %c0_i32_1 = arith.constant 0 : i32
    return %c0_i32, %arg0, %c0_i32_0 : i32, i32, i32
  }
  func.func @transform_2(%arg0: i32) -> (i32, i32, i32) {
    %c0_i32 = arith.constant 0 : i32
    %c0_i32_0 = arith.constant 0 : i32
    %c0_i32_1 = arith.constant 0 : i32
    return %c0_i32, %arg0, %c0_i32_0 : i32, i32, i32
  }
}

</mosaic_0001>

<bundles_post_ra>
// kernel: blinn_phong_forward.1
= control target key start
LH: loop header
LB: loop body
LE: loop exit
PB: predicated region body
PF: predicated region fallthrough
CT: control target
= control target key end

     0   :  { %7 = vsyncpa [#allocation3], 0  ;;  %s241_s12 = smov [#allocation2]   ;;  %s314_s0 = inlined_call_operand.vmem [shape: f32[12], index: 0, kind: input, shape index: {}]   ;;  %s315_s1 = inlined_call_operand.vmem [shape: f32[10,2,128], index: 1, kind: input, shape index: {}]   ;;  %s316_s2 = inlined_call_operand.vmem [shape: f32[3,2,128], index: 2, kind: output, shape index: {}]  }
   0x1   :  { %s13_s11 = sshll.u32 %s314_s0, 4  ;;  %s14_s11 = int_to_ptr.vmem [resolvable:$true] %s13_s11 }
   0x2   :  { %16 = dma.vmem_to_smem %s14_s11, 16, %s241_s12, [#allocation3]  }
   0x3   :  { %239 = dma.done.wait [#allocation3], 16  }
   0x4   :  { %240 = vsyncadd [#allocation3], 4294967280 }
   0x5   :  { %23 = sfence }
   0x6   :  { %s43_s13 = sld [smem:[#allocation2]]  ;;  %v24_v0 = vld [vmem:[%s315_s1] sm:$0x3]  ;;  %v192_v1 = vld [vmem:[%s315_s1 + $0x2] sm:$0x3] }
   0x7   :  { %s201_s14 = sld [smem:[#allocation2 + $0x1]]  ;;  %v193_v2 = vld [vmem:[%s315_s1 + $0x4] sm:$0x3]  ;;  %v272_v24 = vld [vmem:[%s315_s1 + $0x6] sm:$0x3] }
   0x8   :  { %s202_s15 = sld [smem:[#allocation2 + $0x2]]  ;;  %v277_v25 = vld [vmem:[%s315_s1 + $0x8] sm:$0x3]  ;;  %v55_v28 = vmul.f32 %v272_v24, %v272_v24  ;;  %v286_v31 = vld [vmem:[%s315_s1 + $0xa] sm:$0x3] }
   0x9   :  { %s203_s16 = sld [smem:[#allocation2 + $0x3]]  ;;  %v56_v29 = vmul.f32 %v277_v25, %v277_v25  ;;  %v58_v33 = vmul.f32 %v286_v31, %v286_v31 }
   0xa   :  { %s204_s19 = sld [smem:[#allocation2 + $0x4]] }
   0xb   :  { %s205_s0 = sld [smem:[#allocation2 + $0x5]]  ;;  %v57_v32 = vadd.f32 %v56_v29, %v55_v28 }
   0xc   :  { %v99_v3 = vstv %s43_s13  ;;  %s206_s4 = sld [smem:[#allocation2 + $0x6]] }
   0xd   :  { %v100_v4 = vsub.f32 %v99_v3, %v24_v0  ;;  %v101_v5 = vstv %s201_s14  ;;  %v59_v37 = vadd.f32 %v58_v33, %v57_v32  ;;  %s209_s5 = sld [smem:[#allocation2 + $0x9]] }
   0xe   :  { %v102_v6 = vsub.f32 %v101_v5, %v192_v1  ;;  %v103_v7 = vstv %s202_s15  ;;  %s207_s6 = sld [smem:[#allocation2 + $0x7]] }
   0xf   :  { %v74_v8 = vstv %s203_s16  ;;  %v104_v9 = vsub.f32 %v103_v7, %v193_v2  ;;  %v105_v10 = vmul.f32 %v100_v4, %v100_v4  ;;  %v60_v42 = vmax.f32 %v59_v37, 1e-24  ;;  %s208_s7 = sld [smem:[#allocation2 + $0x8]] }
  0x10   :  { %v75_v11 = vsub.f32 %v74_v8, %v24_v0  ;;  %v76_v12 = vstv %s204_s19  ;;  %v106_v13 = vmul.f32 %v102_v6, %v102_v6  ;;  %s210_s10 = sld [smem:[#allocation2 + $0xa]] }
  0x11   :  { %v77_v14 = vsub.f32 %v76_v12, %v192_v1  ;;  %v78_v15 = vstv %s205_s0  ;;  %v108_v16 = vmul.f32 %v104_v9, %v104_v9  ;;  %vm67_vm6 = vweird.f32 %v60_v42  ;;  %s211_s15 = sld [smem:[#allocation2 + $0xb]] }
  0x12   :  { %v79_v17 = vsub.f32 %v78_v15, %v193_v2  ;;  %v80_v18 = vmul.f32 %v75_v11, %v75_v11  ;;  %v107_v19 = vadd.f32 %v106_v13, %v105_v10 }
  0x13   :  { %v81_v20 = vmul.f32 %v77_v14, %v77_v14 }
  0x14   :  { %v83_v21 = vmul.f32 %v79_v17, %v79_v17  ;;  %v109_v22 = vadd.f32 %v108_v16, %v107_v19 }
  0x15   :  { %v82_v23 = vadd.f32 %v81_v20, %v80_v18 }
  0x16   :  { %v110_v26 = vmax.f32 %v109_v22, 1e-24 }
  0x17   :  { %v84_v27 = vadd.f32 %v83_v21, %v82_v23 }
  0x18   :  { %215 = vrsqrt.f32 %v110_v26  ;;  %vm117_vm0 = vweird.f32 %v110_v26 }
  0x19   :  { %v85_v30 = vmax.f32 %v84_v27, 1e-24 }
  0x1b   :  { %217 = vrsqrt.f32 %v85_v30  ;;  %vm92_vm2 = vweird.f32 %v85_v30 }
  0x1c   :  { %219 = vrsqrt.f32 %v60_v42 }
  0x1e   :  { %v216_v34 = vpop.eup %215 }
  0x1f   :  { %v112_v35 = vmul.f32 %v216_v34, %v110_v26  ;;  %vm118_vm1 = vweird.f32 %v216_v34 }
  0x20   :  { %vm119_vm4 = vmor %vm117_vm0, %vm118_vm1 }
  0x21   :  { %v218_v36 = vpop.eup %217  ;;  %v113_v38 = vmul.f32 %v216_v34, %v112_v35 }
  0x22   :  { %v87_v39 = vmul.f32 %v218_v36, %v85_v30  ;;  %vm93_vm3 = vweird.f32 %v218_v36  ;;  %v220_v56 = vpop.eup %219 }
  0x23   :  { %v114_v40 = vmul.f32 0.5, %v113_v38  ;;  %vm94_vm5 = vmor %vm92_vm2, %vm93_vm3  ;;  %v62_v63 = vmul.f32 %v220_v56, %v60_v42  ;;  %vm68_vm7 = vweird.f32 %v220_v56  ;;  %v197_v38 = vld [vmem:[%s315_s1 + $0xc] sm:$0x3] }
  0x24   :  { %v88_v41 = vmul.f32 %v218_v36, %v87_v39  ;;  %vm69_vm8 = vmor %vm67_vm6, %vm68_vm7 }
  0x25   :  { %v115_v43 = vsub.f32 1.5, %v114_v40  ;;  %v63_v2 = vmul.f32 %v220_v56, %v62_v63  ;;  %v198_v40 = vld [vmem:[%s315_s1 + $0xe] sm:$0x3] }
  0x26   :  { %v89_v44 = vmul.f32 0.5, %v88_v41  ;;  %v199_v41 = vld [vmem:[%s315_s1 + $0x10] sm:$0x3] }
  0x27   :  { %v116_v45 = vmul.f32 %v216_v34, %v115_v43 }
  0x28   :  { %v90_v46 = vsub.f32 1.5, %v89_v44 }
  0x29   :  { %v120_v47 = vsel %vm119_vm4, %v216_v34, %v116_v45 }
  0x2a   :  { %v91_v48 = vmul.f32 %v218_v36, %v90_v46  ;;  %v121_v49 = vmul.f32 %v120_v47, %v100_v4  ;;  %v122_v50 = vmul.f32 %v120_v47, %v102_v6  ;;  %v123_v51 = vmul.f32 %v120_v47, %v104_v9 }
  0x2b   :  { %v64_v4 = vmul.f32 0.5, %v63_v2  ;;  %v166_v46 = vstv %s206_s4  ;;  %v173_v47 = vstv %s207_s6 }
  0x2c   :  { %v95_v52 = vsel %vm94_vm5, %v218_v36, %v91_v48  ;;  %v181_v48 = vstv %s208_s7 }
  0x2d   :  { %v96_v53 = vmul.f32 %v95_v52, %v75_v11  ;;  %v97_v54 = vmul.f32 %v95_v52, %v77_v14  ;;  %v98_v55 = vmul.f32 %v95_v52, %v79_v17  ;;  %v65_v5 = vsub.f32 1.5, %v64_v4 }
  0x2e   :  { %v168_v52 = vstv %s209_s5 }
  0x2f   :  { %v124_v57 = vadd.f32 %v121_v49, %v96_v53  ;;  %v125_v58 = vadd.f32 %v122_v50, %v97_v54  ;;  %v126_v59 = vadd.f32 %v123_v51, %v98_v55  ;;  %v66_v8 = vmul.f32 %v220_v56, %v65_v5 }
  0x31   :  { %v127_v60 = vmul.f32 %v124_v57, %v124_v57  ;;  %v128_v61 = vmul.f32 %v125_v58, %v125_v58  ;;  %v130_v62 = vmul.f32 %v126_v59, %v126_v59  ;;  %v70_v11 = vsel %vm69_vm8, %v220_v56, %v66_v8 }
  0x32   :  { %v71_v14 = vmul.f32 %v272_v24, %v70_v11  ;;  %v72_v15 = vmul.f32 %v277_v25, %v70_v11  ;;  %v73_v16 = vmul.f32 %v286_v31, %v70_v11  ;;  %v200_v24 = vld [vmem:[%s315_s1 + $0x12] sm:$0x3] }
  0x33   :  { %v129_v0 = vadd.f32 %v128_v61, %v127_v60  ;;  %v158_v31 = vmax.f32 %v200_v24, 0.0 }
  0x34   :  { %v146_v29 = vmul.f32 %v96_v53, %v71_v14  ;;  %v147_v30 = vmul.f32 %v97_v54, %v72_v15  ;;  %v149_v32 = vmul.f32 %v98_v55, %v73_v16  ;;  %v175_v53 = vstv %s210_s10 }
  0x35   :  { %v131_v1 = vadd.f32 %v130_v62, %v129_v0  ;;  %v183_v54 = vstv %s211_s15 }
  0x36   :  { %v148_v25 = vadd.f32 %v147_v30, %v146_v29 }
  0x37   :  { %v132_v3 = vmax.f32 %v131_v1, 1e-24 }
  0x38   :  { %v150_v35 = vadd.f32 %v149_v32, %v148_v25 }
  0x39   :  { %221 = vrsqrt.f32 %v132_v3  ;;  %vm139_vm9 = vweird.f32 %v132_v3 }
  0x3a   :  { %v151_v39 = vmax.f32 %v150_v35, 0.0 }
  0x3c   :  { %v164_v42 = vmul.f32 %v197_v38, %v151_v39  ;;  %v171_v43 = vmul.f32 %v198_v40, %v151_v39  ;;  %v179_v44 = vmul.f32 %v199_v41, %v151_v39 }
  0x3f   :  { %v222_v6 = vpop.eup %221 }
  0x40   :  { %v134_v7 = vmul.f32 %v222_v6, %v132_v3  ;;  %vm140_vm10 = vweird.f32 %v222_v6 }
  0x41   :  { %vm141_vm11 = vmor %vm139_vm9, %vm140_vm10 }
  0x42   :  { %v135_v9 = vmul.f32 %v222_v6, %v134_v7 }
  0x44   :  { %v136_v10 = vmul.f32 0.5, %v135_v9 }
  0x46   :  { %v137_v12 = vsub.f32 1.5, %v136_v10 }
  0x48   :  { %v138_v13 = vmul.f32 %v222_v6, %v137_v12 }
  0x4a   :  { %v142_v17 = vsel %vm141_vm11, %v222_v6, %v138_v13 }
  0x4b   :  { %v143_v18 = vmul.f32 %v142_v17, %v124_v57  ;;  %v144_v19 = vmul.f32 %v142_v17, %v125_v58  ;;  %v145_v20 = vmul.f32 %v142_v17, %v126_v59 }
  0x4d   :  { %v152_v21 = vmul.f32 %v143_v18, %v71_v14  ;;  %v153_v22 = vmul.f32 %v144_v19, %v72_v15  ;;  %v155_v23 = vmul.f32 %v145_v20, %v73_v16 }
  0x4f   :  { %v154_v26 = vadd.f32 %v153_v22, %v152_v21 }
  0x51   :  { %v156_v27 = vadd.f32 %v155_v23, %v154_v26 }
  0x53   :  { %v157_v28 = vmax.f32 %v156_v27, 1e-06 }
  0x55   :  { %223 = vlog2.f32 %v157_v28 }
  0x5b   :  { %v224_v33 = vpop.eup %223 }
  0x5c   :  { %v160_v34 = vmul.f32 0.6931472, %v224_v33 }
  0x5e   :  { %v161_v36 = vmul.f32 %v160_v34, %v158_v31 }
  0x60   :  { %v162_v37 = vmul.f32 1.442695, %v161_v36 }
  0x62   :  { %225 = vpow2.f32 %v162_v37 }
  0x68   :  { %v226_v45 = vpop.eup %225 }
  0x69   :  { %v165_v49 = vadd.f32 %v226_v45, %v164_v42  ;;  %v172_v50 = vadd.f32 %v226_v45, %v171_v43  ;;  %v180_v51 = vadd.f32 %v226_v45, %v179_v44 }
  0x6b   :  { %v167_v55 = vmul.f32 %v166_v46, %v165_v49  ;;  %v174_v56 = vmul.f32 %v173_v47, %v172_v50  ;;  %v182_v57 = vmul.f32 %v181_v48, %v180_v51 }
  0x6d   :  { %v169_v58 = vadd.f32 %v168_v52, %v167_v55  ;;  %v176_v59 = vadd.f32 %v175_v53, %v174_v56  ;;  %v184_v60 = vadd.f32 %v183_v54, %v182_v57 }
  0x6f   :  { %170 = vst [vmem:[%s316_s2] sm:$0x3] %v169_v58 }
  0x70   :  { %212 = vst [vmem:[%s316_s2 + $0x2] sm:$0x3] %v176_v59 }
  0x71   :  { %213 = vst [vmem:[%s316_s2 + $0x4] sm:$0x3] %v184_v60 }
  0x72   :  { %191 = vsyncpa [#allocation3], 1 }

</bundles_post_ra>
